<compile_context>
chip_gen: v7x
topology: tpu7x:2x2x1
jax: 0.10.0
libtpu: 0.0.40
codegen_flags: <defaults>
</compile_context>

<pallas_src>
import jax
import jax.numpy as jnp
from jax.experimental import pallas as pl
from jax.experimental.pallas import tpu as pltpu


def face_embedding_forward(x, conv_w, conv_b, *, batch_tile=8, rows_per_step=512):
    """x: (N, Cin, H, W) NCHW f32; conv_w: (Cout, Cin, 3, 3); conv_b: (Cout,).
    Returns L2-normalized embedding of shape (N, Cout, 1, 1), matching the PyTorch module."""
    n, cin, h, w = x.shape
    cout, cin_w, kh, kw = conv_w.shape
    assert cin_w == cin and kh == kw
    k = kh
    pad = k // 2
    s = h * w                 # output pixels per sample
    p = cin * k * k           # im2col patch width = MXU contraction depth (36)

    # Batch tile: keep >= 4 grid steps on the parallel batch axis when possible so both
    # v7x TensorCores get work and there is pipeline overlap (tb=1 for N=2).
    tb = max(1, min(batch_tile, n // 4))
    n_pad = ((n + tb - 1) // tb) * tb

    # Per-sample pixel-row chunk (reduction grid axis).  ~512 total rows per matmul,
    # multiple of 16 (bf16 sublane tile).  Bounds per-step VMEM independent of H*W:
    # x block per buffer = tb*chunk*128(lane-padded)*2B, well under the scoped default
    # on all generations (incl. v7x's 64 MiB physical VMEM).
    chunk = max(16, ((rows_per_step // tb) // 16) * 16)
    chunk = min(chunk, ((s + 15) // 16) * 16)
    s_pad = ((s + chunk - 1) // chunk) * chunk
    n_chunks = s_pad // chunk

    # --- wrapper-side layout plumbing (cheap fused XLA ops) ---
    # im2col: NCHW -> NHWC, 'same' zero-pad, gather the 3x3 taps onto the lane dim.
    # Patch ordering is tap-major / cin-minor: p = (di*k + dj)*cin + c.
    xh = jnp.transpose(x, (0, 2, 3, 1))
    xh = jnp.pad(xh, ((0, n_pad - n), (pad, pad), (pad, pad), (0, 0)))
    patches = jnp.concatenate(
        [xh[:, di:di + h, dj:dj + w, :] for di in range(k) for dj in range(k)],
        axis=-1)                                          # (n_pad, h, w, k*k*cin)
    patches = patches.reshape(n_pad, s, p)
    patches = jnp.pad(patches, ((0, 0), (0, s_pad - s), (0, 0))).astype(jnp.bfloat16)

    # conv_w (cout, cin, k, k) -> (k*k*cin, cout) in the same tap-major/cin-minor order.
    w_mat = jnp.transpose(conv_w, (2, 3, 1, 0)).reshape(p, cout).astype(jnp.bfloat16)
    b_mat = conv_b.reshape(1, cout).astype(jnp.float32)

    def kernel(x_ref, w_ref, b_ref, o_ref, acc_ref):
        # x_ref  : (tb, chunk, p)  bf16 — im2col patch rows for this (batch tile, chunk)
        # w_ref  : (p, cout)       bf16 — flattened conv weights
        # b_ref  : (1, cout)       f32
        # o_ref  : (tb, 1, cout)   f32  — L2-normalized embeddings
        # acc_ref: (tb, cout)      f32  — running per-sample pooled sum (VMEM scratch)
        c = pl.program_id(1)

        @pl.when(c == 0)
        def _():
            acc_ref[...] = jnp.zeros_like(acc_ref)

        # Single K=36 bf16 MXU matmul for the whole 3x3 conv on this chunk.
        xv = x_ref[...].reshape(tb * chunk, p)            # layout-trivial leading-dim merge
        y = jnp.dot(xv, w_ref[...], preferred_element_type=jnp.float32)
        y = jnp.maximum(y + b_ref[...], 0.0)              # bias + ReLU (f32 epilogue)
        y3 = y.reshape(tb, chunk, cout)
        if s_pad != s:
            # Mask pixel rows that are pure chunk-alignment padding (their conv output
            # would be relu(bias), which must not leak into the pool).
            row = jax.lax.broadcasted_iota(jnp.int32, (1, chunk, 1), 1) + c * chunk
            y3 = jnp.where(row < s, y3, 0.0)
        # Partial global pool: per-sample row sum (the /HW of the mean is dropped —
        # the L2 normalization below is scale invariant).
        acc_ref[...] += jnp.sum(y3, axis=1)

        @pl.when(c == n_chunks - 1)
        def _():
            emb = acc_ref[...]                            # (tb, cout)
            # L2 normalize along the channel dim (matches x / torch.norm(x, dim=1)).
            # Note: a zero-norm embedding yields NaN, exactly like the PyTorch reference.
            o_ref[...] = (emb * jax.lax.rsqrt(
                jnp.sum(emb * emb, axis=1, keepdims=True)))[:, None, :]

    out = pl.pallas_call(
        kernel,
        out_shape=jax.ShapeDtypeStruct((n_pad, 1, cout), jnp.float32),
        grid_spec=pltpu.PrefetchScalarGridSpec(
            num_scalar_prefetch=0,
            grid=(n_pad // tb, n_chunks),                 # reduction (chunk) axis last
            in_specs=[
                pl.BlockSpec((tb, chunk, p), lambda b, c: (b, c, 0)),
                pl.BlockSpec((p, cout), lambda b, c: (0, 0)),
                pl.BlockSpec((1, cout), lambda b, c: (0, 0)),
            ],
            out_specs=pl.BlockSpec((tb, 1, cout), lambda b, c: (b, 0, 0)),
            scratch_shapes=[pltpu.VMEM((tb, cout), jnp.float32)],
        ),
        compiler_params=pltpu.CompilerParams(
            dimension_semantics=("parallel", "arbitrary")),
    )(patches, w_mat, b_mat)

    return out[:n, 0, :].reshape(n, cout, 1, 1)


if __name__ == "__main__":
    key = jax.random.PRNGKey(0)
    k_x, k_w, k_b = jax.random.split(key, 3)

    N, Cin, H, W = 2, 4, 16, 16
    Cout, K = 32, 3

    x = jax.random.normal(k_x, (N, Cin, H, W), dtype=jnp.float32)
    conv_w = jax.random.normal(k_w, (Cout, Cin, K, K), dtype=jnp.float32) * 0.1
    conv_b = jax.random.normal(k_b, (Cout,), dtype=jnp.float32) * 0.1

    out = face_embedding_forward(x, conv_w, conv_b)
    jax.block_until_ready(out)

    # Pure-JAX reference: same backbone + L2 normalize over dim=1.  Inputs are rounded
    # to bf16 (the kernel's deliberate quantization choice) so the check isolates kernel
    # correctness; remaining differences are accumulation order / MXU precision only.
    xb = x.astype(jnp.bfloat16).astype(jnp.float32)
    wb = conv_w.astype(jnp.bfloat16).astype(jnp.float32)
    y_ref = jax.lax.conv_general_dilated(
        xb, wb, window_strides=(1, 1), padding="SAME",
        dimension_numbers=("NCHW", "OIHW", "NCHW"))
    y_ref = jnp.maximum(y_ref + conv_b[None, :, None, None], 0.0)
    emb_ref = jnp.mean(y_ref, axis=(2, 3), keepdims=True)            # (N, Cout, 1, 1)
    ref = emb_ref / jnp.linalg.norm(emb_ref, axis=1, keepdims=True)

    assert out.shape == (N, Cout, 1, 1)
    assert bool(jnp.allclose(out, ref, atol=1e-2, rtol=1e-2))
    print("KERNEL_OK")
</pallas_src>

<mosaic_0001>
module attributes {stable_mosaic.version = 11 : i64} {
  func.func @kernel(%arg0: i32, %arg1: i32, %arg2: memref<1x256x36xbf16, #tpu.memory_space<vmem>>, %arg3: memref<36x32xbf16, #tpu.memory_space<vmem>>, %arg4: memref<1x32xf32, #tpu.memory_space<vmem>>, %arg5: memref<1x1x32xf32, #tpu.memory_space<vmem>>, %arg6: memref<1x32xf32, #tpu.memory_space<vmem>>) attributes {dimension_semantics = [#tpu.dimension_semantics<parallel>, #tpu.dimension_semantics<arbitrary>], iteration_bounds = array<i64: 2, 1>, scalar_prefetch = 0 : i64, scratch_operands = 1 : i64, tpu.core_type = #tpu.core_type<tc>, window_params = [{transform_indices = @transform_0, window_bounds = array<i64: 1, 256, 36>}, {pipeline_mode = #tpu.pipeline_mode<synchronous>, transform_indices = @transform_1, window_bounds = array<i64: 36, 32>}, {pipeline_mode = #tpu.pipeline_mode<synchronous>, transform_indices = @transform_2, window_bounds = array<i64: 1, 32>}, {transform_indices = @transform_3, window_bounds = array<i64: 1, 1, 32>}]} {
    %c0_i32 = arith.constant 0 : i32
    %0 = arith.cmpi eq, %arg1, %c0_i32 : i32
    %1 = arith.extui %0 : i1 to i32
    %c0_i32_0 = arith.constant 0 : i32
    %2 = arith.cmpi ne, %1, %c0_i32_0 : i32
    scf.if %2 {
      %cst_15 = arith.constant 0.000000e+00 : f32
      %20 = vector.broadcast %cst_15 : f32 to vector<1x32xf32>
      %c0_16 = arith.constant 0 : index
      %c0_17 = arith.constant 0 : index
      %21 = vector.load %arg6[%c0_16, %c0_17] : memref<1x32xf32, #tpu.memory_space<vmem>>, vector<1x32xf32>
      tpu.vector_store %arg6[%c0_16, %c0_17], %20 {strides = array<i32>} : memref<1x32xf32, #tpu.memory_space<vmem>>, vector<1x32xf32>,
    } else {
    }
    %c0 = arith.constant 0 : index
    %c0_1 = arith.constant 0 : index
    %c0_2 = arith.constant 0 : index
    %3 = vector.load %arg2[%c0, %c0_1, %c0_2] : memref<1x256x36xbf16, #tpu.memory_space<vmem>>, vector<1x256x36xbf16>
    %4 = vector.shape_cast %3 : vector<1x256x36xbf16> to vector<256x36xbf16>
    %c0_3 = arith.constant 0 : index
    %c0_4 = arith.constant 0 : index
    %5 = vector.load %arg3[%c0_3, %c0_4] : memref<36x32xbf16, #tpu.memory_space<vmem>>, vector<36x32xbf16>
    %cst = arith.constant dense<0.000000e+00> : vector<256x32xf32>
    %6 = tpu.matmul %4, %5, %cst {dimension_numbers = #tpu.dot_dimension_numbers<[1], [0], [0], [1], [0, 0, 1, 1], [], []>} : vector<256x36xbf16>, vector<36x32xbf16>, vector<256x32xf32> -> vector<256x32xf32>
    %c0_5 = arith.constant 0 : index
    %c0_6 = arith.constant 0 : index
    %7 = vector.load %arg4[%c0_5, %c0_6] : memref<1x32xf32, #tpu.memory_space<vmem>>, vector<1x32xf32>
    %8 = vector.broadcast %7 : vector<1x32xf32> to vector<256x32xf32>
    %9 = arith.addf %6, %8 : vector<256x32xf32>
    %cst_7 = arith.constant 0.000000e+00 : f32
    %10 = vector.broadcast %cst_7 : f32 to vector<256x32xf32>
    %11 = arith.maximumf %9, %10 : vector<256x32xf32>
    %12 = vector.shape_cast %11 : vector<256x32xf32> to vector<1x256x32xf32>
    %c0_8 = arith.constant 0 : index
    %c0_9 = arith.constant 0 : index
    %13 = vector.load %arg6[%c0_8, %c0_9] : memref<1x32xf32, #tpu.memory_space<vmem>>, vector<1x32xf32>
    %cst_10 = arith.constant dense<0.000000e+00> : vector<1x32xf32>
    %14 = vector.multi_reduction <add>, %12, %cst_10 [1] : vector<1x256x32xf32> to vector<1x32xf32>
    %15 = arith.addf %13, %14 : vector<1x32xf32>
    %c0_11 = arith.constant 0 : index
    %c0_12 = arith.constant 0 : index
    %16 = vector.load %arg6[%c0_11, %c0_12] : memref<1x32xf32, #tpu.memory_space<vmem>>, vector<1x32xf32>
    tpu.vector_store %arg6[%c0_11, %c0_12], %15 {strides = array<i32>} : memref<1x32xf32, #tpu.memory_space<vmem>>, vector<1x32xf32>,
    %c0_i32_13 = arith.constant 0 : i32
    %17 = arith.cmpi eq, %arg1, %c0_i32_13 : i32
    %18 = arith.extui %17 : i1 to i32
    %c0_i32_14 = arith.constant 0 : i32
    %19 = arith.cmpi ne, %18, %c0_i32_14 : i32
    scf.if %19 {
      %c0_15 = arith.constant 0 : index
      %c0_16 = arith.constant 0 : index
      %20 = vector.load %arg6[%c0_15, %c0_16] : memref<1x32xf32, #tpu.memory_space<vmem>>, vector<1x32xf32>
      %21 = arith.mulf %20, %20 : vector<1x32xf32>
      %cst_17 = arith.constant dense<0.000000e+00> : vector<1xf32>
      %22 = vector.multi_reduction <add>, %21, %cst_17 [1] : vector<1x32xf32> to vector<1xf32>
      %23 = vector.shape_cast %22 : vector<1xf32> to vector<1x1xf32>
      %24 = math.rsqrt %23 : vector<1x1xf32>
      %25 = vector.broadcast %24 : vector<1x1xf32> to vector<1x32xf32>
      %26 = arith.mulf %20, %25 : vector<1x32xf32>
      %27 = vector.shape_cast %26 : vector<1x32xf32> to vector<1x1x32xf32>
      %c0_18 = arith.constant 0 : index
      %c0_19 = arith.constant 0 : index
      %c0_20 = arith.constant 0 : index
      %28 = vector.load %arg5[%c0_18, %c0_19, %c0_20] : memref<1x1x32xf32, #tpu.memory_space<vmem>>, vector<1x1x32xf32>
      tpu.vector_store %arg5[%c0_18, %c0_19, %c0_20], %27 {strides = array<i32>} : memref<1x1x32xf32, #tpu.memory_space<vmem>>, vector<1x1x32xf32>,
    } else {
    }
    return
  }
  func.func @transform_0(%arg0: i32, %arg1: i32) -> (i32, i32, i32) {
    %c0_i32 = arith.constant 0 : i32
    %c0_i32_0 = arith.constant 0 : i32
    return %arg0, %arg1, %c0_i32 : i32, i32, i32
  }
  func.func @transform_1(%arg0: i32, %arg1: i32) -> (i32, i32) {
    %c0_i32 = arith.constant 0 : i32
    %c0_i32_0 = arith.constant 0 : i32
    %c0_i32_1 = arith.constant 0 : i32
    return %c0_i32, %c0_i32_0 : i32, i32
  }
  func.func @transform_2(%arg0: i32, %arg1: i32) -> (i32, i32) {
    %c0_i32 = arith.constant 0 : i32
    %c0_i32_0 = arith.constant 0 : i32
    %c0_i32_1 = arith.constant 0 : i32
    return %c0_i32, %c0_i32_0 : i32, i32
  }
  func.func @transform_3(%arg0: i32, %arg1: i32) -> (i32, i32, i32) {
    %c0_i32 = arith.constant 0 : i32
    %c0_i32_0 = arith.constant 0 : i32
    %c0_i32_1 = arith.constant 0 : i32
    return %arg0, %c0_i32, %c0_i32_0 : i32, i32, i32
  }
}

</mosaic_0001>

<bundles_post_ra>
// kernel: tpu_custom_call.1
= control target key start
LH: loop header
LB: loop body
LE: loop exit
PB: predicated region body
PF: predicated region fallthrough
CT: control target
= control target key end

     0   :  { %8 = vsyncpa [#allocation4], 0  ;;  %s1307_s0 = inlined_call_operand.vmem [shape: bf16[2,256,36], index: 0, kind: input, shape index: {}]   ;;  %s1308_s1 = inlined_call_operand.vmem [shape: bf16[36,32], index: 1, kind: input, shape index: {}]   ;;  %s1309_s2 = inlined_call_operand.vmem [shape: f32[1,32], index: 2, kind: input, shape index: {}]   ;;  %s1310_s3 = inlined_call_operand.hbm [shape: f32[2,1,32], index: 3, kind: output, shape index: {}]  }
   0x1   :  { %10 = vsyncpa [#allocation4 + $0x1], 0  ;;  %s1046_s12 = smov 0   ;;  %s1048_s13 = smov 0  }
   0x2   :  { %s1050_s14 = smov 0   ;;  %s1052_s15 = smov 0  }
   0x3   :  { %s1054_s16 = smov 0   ;;  %s1056_s17 = smov 0  }
   0x4 LB: > { %s755_s18 = sadd.s32 4294967295, %s1022_s17   ;;  %s756_s19 = sadd.s32 4294967294, %s1022_s17   ;;  %s1022_s17 = sphi %s1056_s17, %s16_s17   ;;  %s1018_s16 = sphi %s1054_s16, %s1317_s16   ;;  %s1014_s15 = sphi %s1052_s15, %s1316_s15   ;;  %s1010_s14 = sphi %s1050_s14, %s1315_s14   ;;  %s1006_s13 = sphi %s1048_s13, %s1314_s13   ;;  %s1002_s12 = sphi %s1046_s12, %s1313_s12  }
   0x5   : > { %s28_s20 = sadd.s32 1, %s1018_s16  ;;  %s105_s21 = sadd.s32 1, %s1010_s14 }
   0x6   : > { %p30_p0 = scmp.ge.s32.totalorder %s28_s20, 2  ;;  %p115_p1 = scmp.ne.s32.totalorder %s1010_s14, %s1006_s13 }
   0x7   : > { %p116_p2 = scmp.eq.s32.totalorder %s755_s18, 1  ;;  %p121_p3 = scmp.ne.s32.totalorder %s1006_s13, %s1002_s12 }
   0x8   : > { %s1319_s20 = smov (%p30_p0, %s28_s20), 0  ;;  %p122_p5 = scmp.eq.s32.totalorder %s756_s19, 1 }
   0x9   : > { %p1086_p4 = por %p116_p2, %p115_p1  ;;  %s102_s23 = ssub.s32 %s1018_s16, %s1319_s20 }
   0xa   : > { %p759_p6 = scmp.ge.s32.totalorder %s1022_s17, 1  ;;  %p103_p7 = scmp.eq.s32.totalorder %s102_s23, 0 }
   0xb   : > { %p1093_p8 = por %p122_p5, %p121_p3  ;;  %p159_p9 = scmp.lt.s32.totalorder %s1022_s17, 3 }
   0xc   : > { %s1099_s25 = scalar_select %p103_p7, %s1010_s14, %s105_s21  }
   0xd   : > { %p160_p10 = pnand %p759_p6, %p159_p9 }
   0xe   : > { %v923_v0 = vld [vmem:[%s1308_s1] sm:$0xff] (!%p160_p10)   ;;  %v924_v1 = vld [vmem:[%s1308_s1 + $0x8] sm:$0xff] (!%p160_p10)   ;;  %p187_p11 = scmp.lt.s32.totalorder (!%p160_p10), %s1014_s15, 1  ;;  %v925_v2 = vld [vmem:[%s1308_s1 + $0x10] ss:$0 sps:$4 sm:$0x33] (!%p160_p10)  }
   0xf   : > { %163 = sbr.rel (%p160_p10) target bundleno = 504 (0x1f8), region = 32  ;;  %821 = vmatprep.subr.bf16.mxu0 (!%p160_p10), %v923_v0  ;;  %859 = vmatprep.subr.bf16.mxu1 (!%p160_p10), %v923_v0  ;;  %vm391_vm0 = vcmask (!%p160_p10), 1041408   ;;  %vm342_vm1 = vcmask (!%p160_p10), 293888   ;;  %vm201_vm2 = vcmask (!%p160_p10), 253952   ;;  %v1024_v20 = vmov (!%p160_p10), 0.0   ;;  %s184_s18 = sand.u32 (!%p160_p10), 1, %s1006_s13  }
  0x10   : > { %822 = vmatpush3.bf16.msra.mxu0 (!%p160_p10), %v923_v0  ;;  %862 = vmatpush3.bf16.msra.mxu1 (!%p160_p10), %v923_v0  ;;  %v393_v4 = vsel (!%p160_p10), %vm391_vm0, %v925_v2, 0  ;;  %202 = vst.msk [vmem:[#allocation2] sm:$0x1] (!%p160_p10), %vm201_vm2, %v1024_v20  ;;  %v1153_v21 = vld [vmem:[%s1309_s2] ss:$0 sm:$0xff] (!%p160_p10)  ;;  %vm589_vm3 = vcmask (!%p160_p10), 261120  }
  0x11   : > { %823 = vmatprep.subr.bf16.mxu0 (!%p160_p10), %v924_v1  ;;  %860 = vmatprep.subr.bf16.mxu1 (!%p160_p10), %v924_v1  ;;  %s798_s19 = sshll.u32 (!%p160_p10), %s1014_s15, 4  ;;  %s185_s21 = scalar_lea.vmem (!%p160_p10), [#allocation3], %s184_s18 }
  0x12   : > { %s686_s23 = sshll.u32 (!%p160_p10), %s185_s21, 4  ;;  %s1259_s28 = scalar_lea.hbm (!%p160_p10), %s1310_s3, %s798_s19  ;;  %s1261_s23 = int_to_ptr.vmem [resolvable:$true] %s686_s23 }
  0x13   : > { %s674_s29 = scalar_lea.sflag (!%p160_p10), [#allocation4], %s184_s18 }
  0x14   : > { %824 = vmatpush3.bf16.msra.mxu0 (!%p160_p10), %v924_v1  ;;  %863 = vmatpush3.bf16.msra.mxu1 (!%p160_p10), %v924_v1 }
  0x15   : > { %865 = vmatprep.subr.msk.bf16.mxu0 (!%p160_p10), %vm391_vm0, %v925_v2  ;;  %866 = vmatprep.subr.msk.bf16.mxu1 (!%p160_p10), %vm391_vm0, %v925_v2 }
  0x16   : > { %s188_s30 = scalar_select %p187_p11, %s1014_s15, 1 }
  0x17   : > { %s1025_s15 = smov [#allocation3]  }
  0x18   : > { %s801_s6 = sshll.u32 %s188_s30, 7  ;;  %826 = vmatpush3.bf16.msra.mxu0 %v393_v4  ;;  %864 = vmatpush3.bf16.msra.mxu1 %v393_v4  ;;  %s944_s30 = scalar_lea.vmem %s1261_s23, 16 }
  0x19   : > { %s1115_s9 = scalar_lea.vmem %s1307_s0, %s801_s6  ;;  %p945_p12 = scmp.ne.s32.totalorder %s1261_s23, %s944_s30 }
  0x1a   : > { %v926_v3 = vld [vmem:[%s1115_s9] sm:$0xff]   ;;  %v927_v5 = vld [vmem:[%s1115_s9 + $0x8] sm:$0xff]   ;;  %v928_v6 = vld [vmem:[%s1115_s9 + $0x10] sm:$0xff]   ;;  %s948_s4 = sshll.u32 %s1025_s15, 4  ;;  %s949_s4 = int_to_ptr.vmem [resolvable:$false] %s948_s4 }
  0x1b   : > { %827 = vmatprep.mubr.msk.bf16.mxu0 %vm342_vm1, %v926_v3  ;;  %v934_v7 = vld [vmem:[%s1115_s9 + $0x40] sm:$0xff]   ;;  %v935_v8 = vld [vmem:[%s1115_s9 + $0x48] sm:$0xff]   ;;  %v936_v9 = vld [vmem:[%s1115_s9 + $0x50] sm:$0xff]   ;;  %p946_p13 = pnand %p945_p12, %p1086_p4  ;;  %s950_s5 = scalar_lea.vmem %s949_s4, 32 }
  0x1c   : > { %828 = vmatmul.mubr.msk.bf16.vlgmr.msra.gmra.mrb[0].mxu0 %vm342_vm1, %v927_v5  ;;  %843 = vmatprep.mubr.msk.bf16.mxu1 %vm342_vm1, %v934_v7  ;;  %v929_v10 = vld [vmem:[%s1115_s9 + $0x18] sm:$0xff]   ;;  %v930_v11 = vld [vmem:[%s1115_s9 + $0x20] sm:$0xff]   ;;  %v931_v14 = vld [vmem:[%s1115_s9 + $0x28] sm:$0xff]   ;;  %p951_p1 = scmp.lt.s32.totalorder %s1261_s23, %s949_s4  ;;  %p952_p2 = scmp.lt.s32.totalorder %s950_s5, %s944_s30 }
  0x1d   : > { %831 = vmatprep.mubr.msk.bf16.mxu0 %vm342_vm1, %v928_v6  ;;  %844 = vmatmul.mubr.msk.bf16.vlgmr.msra.gmra.mrb[0].mxu1 %vm342_vm1, %v935_v8  ;;  %v937_v12 = vld [vmem:[%s1115_s9 + $0x58] sm:$0xff]   ;;  %v938_v13 = vld [vmem:[%s1115_s9 + $0x60] sm:$0xff]   ;;  %v932_v15 = vld [vmem:[%s1115_s9 + $0x30] sm:$0xff]   ;;  %p947_p0 = pneg %p946_p13 }
  0x1e   : > { %847 = vmatprep.mubr.msk.bf16.mxu1 %vm342_vm1, %v936_v9  ;;  %v939_v16 = vld [vmem:[%s1115_s9 + $0x68] sm:$0xff]   ;;  %v940_v17 = vld [vmem:[%s1115_s9 + $0x70] sm:$0xff]   ;;  %v933_v18 = vld [vmem:[%s1115_s9 + $0x38] sm:$0xff]   ;;  %p953_p3 = por %p952_p2, %p951_p1 }
  0x1f   : > { %v941_v19 = vld [vmem:[%s1115_s9 + $0x78] sm:$0xff]  }
  0x20   : > { %p954_p5 = pnand %p953_p3, %p947_p0 }
  0x24   : > { %832 = vmatmul.mubr.msk.bf16.gmra.mrb[4].mxu0 %vm342_vm1, %v929_v10 }
  0x25   : > { %835 = vmatprep.mubr.msk.bf16.mxu0 %vm342_vm1, %v930_v11  ;;  %848 = vmatmul.mubr.msk.bf16.gmra.mrb[4].mxu1 %vm342_vm1, %v937_v12 }
  0x26   : > { %851 = vmatprep.mubr.msk.bf16.mxu1 %vm342_vm1, %v938_v13 }
  0x2c   : > { %836 = vmatmul.mubr.msk.bf16.gmra.mrb[8].mxu0 %vm342_vm1, %v931_v14 }
  0x2d   : > { %839 = vmatprep.mubr.msk.bf16.mxu0 %vm342_vm1, %v932_v15  ;;  %852 = vmatmul.mubr.msk.bf16.gmra.mrb[8].mxu1 %vm342_vm1, %v939_v16 }
  0x2e   : > { %855 = vmatprep.mubr.msk.bf16.mxu1 %vm342_vm1, %v940_v17 }
  0x34   : > { %840 = vmatmul.mubr.msk.bf16.gmra.mrb[12].mxu0 %vm342_vm1, %v933_v18 }
  0x35   : > { %856 = vmatmul.mubr.msk.bf16.gmra.mrb[12].mxu1 %vm342_vm1, %v941_v19 }
  0xef   : > { %v829_v22 = vpop.f32.mrb[0].mxu0 }
  0xf0   : > { %v429_v23 = vpop.f32.mrb[1].mxu0  ;;  %v438_v24 = vadd.f32 %v829_v22, %v1153_v21  ;;  %v1159_v31 = vpop.f32.mrb[0].mxu1 }
  0xf1   : > { %v430_v25 = vadd.f32 %v1153_v21, %v429_v23  ;;  %v830_v26 = vpop.f32.mrb[2].mxu0  ;;  %v1161_v32 = vpop.f32.mrb[1].mxu1 }
  0xf2   : > { %v432_v27 = vpop.f32.mrb[3].mxu0  ;;  %v441_v29 = vadd.f32 %v830_v26, %v1153_v21  ;;  %v558_v33 = vmax.f32 %v438_v24, 0.0  ;;  %v1163_v35 = vpop.f32.mrb[2].mxu1 }
  0xf3   : > { %v556_v28 = vmax.f32 %v430_v25, 0.0  ;;  %v433_v30 = vadd.f32 %v1153_v21, %v432_v27  ;;  %v1165_v36 = vpop.f32.mrb[3].mxu1 }
  0xf4   : > { %v559_v38 = vmax.f32 %v441_v29, 0.0  ;;  %v593_v43 = vsel %vm589_vm3, %v558_v33, 0.0 }
  0xf5   : > { %v557_v34 = vmax.f32 %v433_v30, 0.0  ;;  %v590_v37 = vsel %vm589_vm3, %v556_v28, 0.0 }
  0xf6   : > { %v595_v49 = vsel %vm589_vm3, %v559_v38, 0.0  ;;  %v494_v38 = vadd.f32 %v1153_v21, %v1161_v32 }
  0xf7   : > { %v591_v39 = vsel %vm589_vm3, %v557_v34, 0.0  ;;  %v833_v40 = vpop.f32.mrb[4].mxu0 }
  0xf8   : > { %v592_v41 = vadd.f32 %v591_v39, %v590_v37  ;;  %v445_v42 = vpop.f32.mrb[5].mxu0  ;;  %v454_v44 = vadd.f32 %v833_v40, %v1153_v21  ;;  %v1175_v53 = vpop.f32.mrb[4].mxu1 }
  0xf9   : > { %v446_v45 = vadd.f32 %v1153_v21, %v445_v42  ;;  %v834_v46 = vpop.f32.mrb[6].mxu0  ;;  %v1177_v55 = vpop.f32.mrb[5].mxu1 }
  0xfa   : > { %v594_v47 = vadd.f32 %v593_v43, %v592_v41  ;;  %v448_v48 = vpop.f32.mrb[7].mxu0  ;;  %v457_v51 = vadd.f32 %v834_v46, %v1153_v21  ;;  %v562_v56 = vmax.f32 %v454_v44, 0.0  ;;  %v1180_v59 = vpop.f32.mrb[6].mxu1 }
  0xfb   : > { %v560_v50 = vmax.f32 %v446_v45, 0.0  ;;  %v449_v52 = vadd.f32 %v1153_v21, %v448_v48  ;;  %v1182_v61 = vpop.f32.mrb[7].mxu1 }
  0xfc   : > { %v596_v54 = vadd.f32 %v595_v49, %v594_v47  ;;  %v563_v62 = vmax.f32 %v457_v51, 0.0  ;;  %v601_v3 = vsel %vm589_vm3, %v562_v56, 0.0  ;;  %v497_v56 = vadd.f32 %v1153_v21, %v1165_v36 }
  0xfd   : > { %v597_v57 = vsel %vm589_vm3, %v560_v50, 0.0  ;;  %v561_v58 = vmax.f32 %v449_v52, 0.0 }
  0xfe   : > { %v598_v60 = vadd.f32 %v597_v57, %v596_v54  ;;  %v603_v9 = vsel %vm589_vm3, %v563_v62, 0.0  ;;  %v572_v54 = vmax.f32 %v494_v38, 0.0 }
  0xff   : > { %v599_v63 = vsel %vm589_vm3, %v561_v58, 0.0  ;;  %v837_v0 = vpop.f32.mrb[8].mxu0 }
 0x100   : > { %v600_v1 = vadd.f32 %v599_v63, %v598_v60  ;;  %v461_v2 = vpop.f32.mrb[9].mxu0  ;;  %v470_v4 = vadd.f32 %v837_v0, %v1153_v21  ;;  %v1191_v13 = vpop.f32.mrb[8].mxu1  ;;  %v502_v60 = vadd.f32 %v1159_v31, %v1153_v21  ;;  %v505_v63 = vadd.f32 %v1163_v35, %v1153_v21 }
 0x101   : > { %v462_v5 = vadd.f32 %v1153_v21, %v461_v2  ;;  %v838_v6 = vpop.f32.mrb[10].mxu0  ;;  %v525_v15 = vpop.f32.mrb[9].mxu1  ;;  %v573_v2 = vmax.f32 %v497_v56, 0.0  ;;  %v513_v31 = vadd.f32 %v1153_v21, %v1182_v61 }
 0x102   : > { %v602_v7 = vadd.f32 %v601_v3, %v600_v1  ;;  %v464_v8 = vpop.f32.mrb[11].mxu0  ;;  %v473_v11 = vadd.f32 %v838_v6, %v1153_v21  ;;  %v566_v16 = vmax.f32 %v470_v4, 0.0  ;;  %v1194_v19 = vpop.f32.mrb[10].mxu1  ;;  %v621_v1 = vsel %vm589_vm3, %v572_v54, 0.0 }
 0x103   : > { %v564_v10 = vmax.f32 %v462_v5, 0.0  ;;  %v465_v12 = vadd.f32 %v1153_v21, %v464_v8  ;;  %v528_v22 = vpop.f32.mrb[11].mxu1  ;;  %v510_v3 = vadd.f32 %v1153_v21, %v1177_v55  ;;  %v574_v36 = vmax.f32 %v502_v60, 0.0 }
 0x104   : > { %v604_v14 = vadd.f32 %v603_v9, %v602_v7  ;;  %v567_v23 = vmax.f32 %v473_v11, 0.0  ;;  %v609_v28 = vsel %vm589_vm3, %v566_v16, 0.0  ;;  %v575_v6 = vmax.f32 %v505_v63, 0.0 }
 0x105   : > { %v605_v17 = vsel %vm589_vm3, %v564_v10, 0.0  ;;  %v565_v18 = vmax.f32 %v465_v12, 0.0  ;;  %v623_v7 = vsel %vm589_vm3, %v573_v2, 0.0  ;;  %v576_v8 = vmax.f32 %v510_v3, 0.0  ;;  %v588_v2 = vld [vmem:[#allocation2] sm:$0x1] }
 0x106   : > { %v606_v20 = vadd.f32 %v605_v17, %v604_v14  ;;  %v611_v39 = vsel %vm589_vm3, %v567_v23, 0.0  ;;  %v625_v35 = vsel %vm589_vm3, %v574_v36, 0.0  ;;  %v518_v10 = vadd.f32 %v1175_v53, %v1153_v21 }
 0x107   : > { %v607_v24 = vsel %vm589_vm3, %v565_v18, 0.0  ;;  %v841_v25 = vpop.f32.mrb[12].mxu0  ;;  %v521_v55 = vadd.f32 %v1180_v59, %v1153_v21  ;;  %v627_v12 = vsel %vm589_vm3, %v575_v6, 0.0  ;;  %v629_v14 = vsel %vm589_vm3, %v576_v8, 0.0 }
 0x108   : > { %v608_v26 = vadd.f32 %v607_v24, %v606_v20  ;;  %v477_v27 = vpop.f32.mrb[13].mxu0  ;;  %v486_v29 = vadd.f32 %v841_v25, %v1153_v21  ;;  %v1205_v43 = vpop.f32.mrb[12].mxu1  ;;  %v577_v16 = vmax.f32 %v513_v31, 0.0  ;;  %v526_v17 = vadd.f32 %v1153_v21, %v525_v15 }
 0x109   : > { %v478_v30 = vadd.f32 %v1153_v21, %v477_v27  ;;  %v842_v33 = vpop.f32.mrb[14].mxu0  ;;  %v541_v45 = vpop.f32.mrb[13].mxu1  ;;  %v578_v20 = vmax.f32 %v518_v10, 0.0  ;;  %v579_v23 = vmax.f32 %v521_v55, 0.0  ;;  %v529_v53 = vadd.f32 %v1153_v21, %v528_v22 }
 0x10a   : > { %v610_v34 = vadd.f32 %v609_v28, %v608_v26  ;;  %v480_v37 = vpop.f32.mrb[15].mxu0  ;;  %v489_v41 = vadd.f32 %v842_v33, %v1153_v21  ;;  %v570_v46 = vmax.f32 %v486_v29, 0.0  ;;  %v858_v49 = vpop.f32.mrb[14].mxu1  ;;  %v631_v24 = vsel %vm589_vm3, %v577_v16, 0.0 }
 0x10b   : > { %v568_v40 = vmax.f32 %v478_v30, 0.0  ;;  %v481_v42 = vadd.f32 %v1153_v21, %v480_v37  ;;  %v544_v51 = vpop.f32.mrb[15].mxu1  ;;  %v580_v25 = vmax.f32 %v526_v17, 0.0  ;;  %v633_v27 = vsel %vm589_vm3, %v578_v20, 0.0 }
 0x10c   : > { %v612_v44 = vadd.f32 %v611_v39, %v610_v34  ;;  %v571_v52 = vmax.f32 %v489_v41, 0.0  ;;  %v617_v58 = vsel %vm589_vm3, %v570_v46, 0.0  ;;  %v534_v59 = vadd.f32 %v1191_v13, %v1153_v21 }
 0x10d   : > { %v613_v47 = vsel %vm589_vm3, %v568_v40, 0.0  ;;  %v569_v48 = vmax.f32 %v481_v42, 0.0  ;;  %v635_v28 = vsel %vm589_vm3, %v579_v23, 0.0  ;;  %v637_v15 = vsel %vm589_vm3, %v580_v25, 0.0 }
 0x10e   : > { %v614_v50 = vadd.f32 %v613_v47, %v612_v44  ;;  %v619_v0 = vsel %vm589_vm3, %v571_v52, 0.0  ;;  %v537_v30 = vadd.f32 %v1194_v19, %v1153_v21  ;;  %v581_v33 = vmax.f32 %v529_v53, 0.0 }
 0x10f   : > { %v615_v32 = vsel %vm589_vm3, %v569_v48, 0.0  ;;  %v542_v34 = vadd.f32 %v1153_v21, %v541_v45  ;;  %v582_v38 = vmax.f32 %v534_v59, 0.0  ;;  %v545_v13 = vadd.f32 %v1153_v21, %v544_v51 }
 0x110   : > { %v616_v57 = vadd.f32 %v615_v32, %v614_v50  ;;  %v583_v39 = vmax.f32 %v537_v30, 0.0  ;;  %v639_v40 = vsel %vm589_vm3, %v581_v33, 0.0  ;;  %v550_v46 = vadd.f32 %v1205_v43, %v1153_v21 }
 0x111   : > { %v584_v41 = vmax.f32 %v542_v34, 0.0  ;;  %v641_v44 = vsel %vm589_vm3, %v582_v38, 0.0  ;;  %v553_v48 = vadd.f32 %v858_v49, %v1153_v21  ;;  %v585_v50 = vmax.f32 %v545_v13, 0.0 }
 0x112   : > { %v618_v62 = vadd.f32 %v617_v58, %v616_v57  ;;  %v643_v19 = vsel %vm589_vm3, %v583_v39, 0.0  ;;  %v586_v32 = vmax.f32 %v550_v46, 0.0 }
 0x113   : > { %v645_v45 = vsel %vm589_vm3, %v584_v41, 0.0  ;;  %v587_v56 = vmax.f32 %v553_v48, 0.0  ;;  %v647_v51 = vsel %vm589_vm3, %v585_v50, 0.0 }
 0x114   : > { %v620_v4 = vadd.f32 %v619_v0, %v618_v62  ;;  %v649_v58 = vsel %vm589_vm3, %v586_v32, 0.0 }
 0x115   : > { %v651_v43 = vsel %vm589_vm3, %v587_v56, 0.0 }
 0x116   : > { %v622_v5 = vadd.f32 %v621_v1, %v620_v4 }
 0x118   : > { %v624_v9 = vadd.f32 %v623_v7, %v622_v5 }
 0x11a   : > { %v626_v11 = vadd.f32 %v625_v35, %v624_v9 }
 0x11c   : > { %v628_v18 = vadd.f32 %v627_v12, %v626_v11 }
 0x11e   : > { %v630_v61 = vadd.f32 %v629_v14, %v628_v18 }
 0x120   : > { %v632_v26 = vadd.f32 %v631_v24, %v630_v61 }
 0x122   : > { %v634_v29 = vadd.f32 %v633_v27, %v632_v26 }
 0x124   : > { %v636_v37 = vadd.f32 %v635_v28, %v634_v29 }
 0x126   : > { %v638_v22 = vadd.f32 %v637_v15, %v636_v37 }
 0x128   : > { %v640_v42 = vadd.f32 %v639_v40, %v638_v22 }
 0x12a   : > { %v642_v47 = vadd.f32 %v641_v44, %v640_v42 }
 0x12c   : > { %v644_v52 = vadd.f32 %v643_v19, %v642_v47 }
 0x12e   : > { %v646_v54 = vadd.f32 %v645_v45, %v644_v52 }
 0x130   : > { %v648_v57 = vadd.f32 %v647_v51, %v646_v54 }
 0x132   : > { %v650_v60 = vadd.f32 %v649_v58, %v648_v57 }
 0x134   : > { %v652_v62 = vadd.f32 %v651_v43, %v650_v60 }
 0x136   : > { %v653_v63 = vrot.slane %v652_v62, 4 }
 0x138   : > { %v654_v0 = vadd.f32 %v653_v63, %v652_v62 }
 0x13a   : > { %v655_v1 = vrot.slane %v654_v0, 2 }
 0x13c   : > { %v656_v21 = vadd.f32 %v655_v1, %v654_v0 }
 0x13e   : > { %v657_v49 = vrot.slane %v656_v21, 1 }
 0x140   : > { %v658_v3 = vadd.f32 %v657_v49, %v656_v21 }
 0x142   : > { %v659_v4 = vadd.f32 %v658_v3, %v588_v2 }
 0x144   : > { %661 = vst.msk [vmem:[#allocation2] sm:$0x1] %vm201_vm2, %v659_v4 }
 0x14b   : > { %v665_v36 = vld [vmem:[#allocation2] sm:$0x1] }
 0x14c   : > { %v666_v5 = vmul.f32 %v665_v36, %v665_v36 }
 0x14e   : > { %v667_v6 = vsel %vm201_vm2, %v666_v5, 0.0 }
 0x14f   : > { %668 = vadd.xlane.f32.xlu0 %v667_v6 }
 0x1dc   : > { %v669_v7 = vpop.xlane.xlu0 %668 }
 0x1dd   : > { %942 = vrsqrt.f32 %v669_v7 }
 0x1e7   : > { %v943_v8 = vpop.eup %942 }
 0x1e8   : > { %v671_v31 = vmul.f32 %v943_v8, %v665_v36 }
 0x1ea   : > { %672 = vst.msk [vmem:[%s185_s21] sm:$0x1] %vm201_vm2, %v671_v31 }
 0x1eb   : > { %957 = shalt.err (!%p954_p5)
}
 0x1ec   : > { %s958_s6 = scalar_lea.hbm %s1259_s28, 16  ;;  %s962_s9 = scalar_lea.hbm %s1310_s3, 32 }
 0x1ed   : > { %p959_p6 = scmp.ne.s32.totalorder %s1259_s28, %s958_s6  ;;  %p963_p10 = scmp.lt.u32.totalorder %s1259_s28, %s1310_s3 }
 0x1ee   : > { %p964_p11 = scmp.lt.u32.totalorder %s962_s9, %s958_s6  ;;  %p966_p13 = scmp.lt.u32.totalorder %s958_s6, %s1259_s28 }
 0x1ef   : > { %p960_p7 = pnand %p959_p6, %p1086_p4 }
 0x1f0   : > { %p965_p12 = por %p964_p11, %p963_p10 }
 0x1f1   : > { %p961_p9 = pneg %p960_p7 }
 0x1f2   : > { %p967_p0 = por %p966_p13, %p965_p12 }
 0x1f4   : > { %p968_p1 = pnand %p967_p0, %p961_p9 }
 0x1f6   : > { %971 = shalt.err (!%p968_p1)
}
 0x1f7   : > { %867 = dma.vmem_to_hbm [thread:$0]  (%p1086_p4), %s1261_s23, 16, %s1259_s28, %s674_s29  }
 0x1f8 PF: > { %p873_p2 = scmp.ge.s32.totalorder %s1022_s17, 2  ;;  %s698_s18 = sand.u32 1, %s1002_s12  }
 0x1f9   : > { %s699_s19 = scalar_lea.sflag [#allocation4], %s698_s18 }
 0x1fa   : > { %p870_p3 = pnand %p873_p2, %p1093_p8 }
 0x1fc   : > { %997 = dma.done.wait (!%p870_p3), %s699_s19, 16  }
 0x1fd   : > { %999 = vsyncadd (!%p870_p3), %s699_s19, 4294967280  ;;  %s16_s17 = sadd.s32 1, %s1022_s17   ;;  %s1313_s12 = smov %s1006_s13 }
 0x1fe   : > { %p13_p5 = scmp.ge.s32.totalorder %s16_s17, 4   ;;  %s1314_s13 = smov %s1010_s14 }
 0x1ff   : > { %s1315_s14 = smov %s1099_s25  ;;  %s1316_s15 = smov %s1018_s16 }
 0x200   : > { %s1317_s16 = smov %s1319_s20  ;;  %15 = sbr.rel (!%p13_p5) target bundleno = 4 (0x4), region = 75 }
 0x207   :  { %703 = vsyncpa [#allocation4], 1 }
 0x208   :  { %705 = vsyncpa [#allocation4 + $0x1], 1 }

</bundles_post_ra>
